<compile_context>
chip_gen: v7x
topology: tpu7x:2x2x1
jax: 0.10.0
libtpu: 0.0.40
codegen_flags: <defaults>
</compile_context>

<pallas_src>
from functools import partial

import jax
import jax.numpy as jnp
from jax.experimental import pallas as pl
from jax.experimental.pallas import tpu as pltpu


# ----------------------------- Pallas kernel ------------------------------

def _conv1x1_kernel(x_ref, w_ref, o_ref, *, c_out):
    """One (batch, spatial) tile of the channel contraction.

    x_ref: (C_in, TM)      activation columns (pixels) for this grid step
    w_ref: (C_out_pad, C_in) weight block, identical every step (VMEM resident)
    o_ref: (C_out, TM)     output columns
    """
    acc = jnp.dot(w_ref[...], x_ref[...], preferred_element_type=jnp.float32)
    o_ref[...] = acc[:c_out, :].astype(o_ref.dtype)


# ------------------------------- wrapper -----------------------------------

def _round_up(x, m):
    return ((x + m - 1) // m) * m


def _pick_tile(hw_pad, tile_hw):
    """Largest multiple of 128 <= tile_hw that divides hw_pad (>=128)."""
    cap = max(128, min(int(tile_hw), hw_pad))
    t = (cap // 128) * 128
    while t > 128:
        if hw_pad % t == 0:
            return t
        t -= 128
    return 128


def net_lin_layer_forward(x_nchw, weight_oihw, *, tile_hw=2048):
    """Forward of NetLinLayer: 1x1 conv, stride 1, no padding, no bias.

    x_nchw:       (B, C_in, H, W)
    weight_oihw:  (C_out, C_in, 1, 1)   (PyTorch Conv2d weight layout)
    returns:      (B, C_out, H, W)
    """
    B, C_in, H, W = x_nchw.shape
    C_out = weight_oihw.shape[0]
    HW = H * W

    # Native-layout flatten: no transpose, no copy.
    x3 = x_nchw.reshape(B, C_in, HW)
    w2d = weight_oihw.reshape(C_out, C_in)

    # Pad weight rows (sublanes) to a multiple of 8; it's a handful of bytes.
    out_pad = _round_up(C_out, 8)
    w_p = jnp.pad(w2d, ((0, out_pad - C_out), (0, 0)))

    # Spatial axis padded to a multiple of 128 (lane-dense); tile divides it.
    hw_pad = _round_up(HW, 128)
    tm = _pick_tile(hw_pad, tile_hw)
    x3p = x3 if hw_pad == HW else jnp.pad(x3, ((0, 0), (0, 0), (0, hw_pad - HW)))

    grid = (B, hw_pad // tm)

    cost = pl.CostEstimate(
        flops=2 * B * hw_pad * C_in * out_pad,
        transcendentals=0,
        bytes_accessed=4 * (B * C_in * hw_pad + out_pad * C_in + B * C_out * hw_pad),
    )

    out = pl.pallas_call(
        partial(_conv1x1_kernel, c_out=C_out),
        out_shape=jax.ShapeDtypeStruct((B, C_out, hw_pad), x_nchw.dtype),
        grid=grid,
        in_specs=[
            # activation: streamed / double-buffered over the (batch, spatial) grid
            pl.BlockSpec((None, C_in, tm), lambda b, i: (b, 0, i)),
            # weights: same block every step -> DMA'd once, stays resident
            pl.BlockSpec((out_pad, C_in), lambda b, i: (0, 0)),
        ],
        out_specs=pl.BlockSpec((None, C_out, tm), lambda b, i: (b, 0, i)),
        compiler_params=pltpu.CompilerParams(
            dimension_semantics=("parallel", "parallel"),
        ),
        cost_estimate=cost,
    )(x3p, w_p)

    if hw_pad != HW:
        out = out[:, :, :HW]
    return out.reshape(B, C_out, H, W)


class NetLinLayer:
    """JAX/Pallas mirror of the PyTorch NetLinLayer (1x1 conv, no bias)."""

    def __init__(self, chn_in, chn_out=1, use_dropout=False, *, key=None):
        self.chn_in = chn_in
        self.chn_out = chn_out
        self.use_dropout = use_dropout  # identity at inference
        if key is None:
            key = jax.random.PRNGKey(0)
        # Kaiming-uniform-ish init for a 1x1 conv (fan_in = chn_in).
        bound = 1.0 / jnp.sqrt(chn_in)
        self.weight = jax.random.uniform(
            key, (chn_out, chn_in, 1, 1), jnp.float32, -bound, bound
        )

    def __call__(self, x_nchw):
        # Dropout in eval mode is identity; only the 1x1 conv remains.
        return net_lin_layer_forward(x_nchw, self.weight)


# --------------------------------- main -------------------------------------

if __name__ == "__main__":
    key = jax.random.PRNGKey(0)
    kx, kw = jax.random.split(key)

    # Small LPIPS-like shapes: B=2, chn_in=64 (first lin layer), chn_out=1, 16x16.
    B, C_in, H, W = 2, 64, 16, 16
    C_out = 1

    x = jax.random.normal(kx, (B, C_in, H, W), jnp.float32)
    weight = jax.random.normal(kw, (C_out, C_in, 1, 1), jnp.float32) * (
        1.0 / jnp.sqrt(C_in)
    )

    fwd = jax.jit(partial(net_lin_layer_forward, tile_hw=2048))
    out = fwd(x, weight)
    jax.block_until_ready(out)

    assert out.shape == (B, C_out, H, W), out.shape

    # Reference: plain channel contraction (what Conv2d(k=1, bias=False) does).
    ref = jnp.einsum("bchw,oc->bohw", x, weight.reshape(C_out, C_in))
    max_err = float(jnp.max(jnp.abs(out - ref)))
    assert max_err < 1e-3, f"max abs error {max_err}"

    print("KERNEL_OK")
</pallas_src>

<mosaic_0001>
module attributes {stable_mosaic.version = 11 : i64} {
  func.func @_conv1x1_kernel(%arg0: i32, %arg1: i32, %arg2: memref<1x64x256xf32, #tpu.memory_space<vmem>>, %arg3: memref<8x64xf32, #tpu.memory_space<vmem>>, %arg4: memref<1x1x256xf32, #tpu.memory_space<vmem>>) attributes {dimension_semantics = [#tpu.dimension_semantics<parallel>, #tpu.dimension_semantics<parallel>], iteration_bounds = array<i64: 2, 1>, scalar_prefetch = 0 : i64, scratch_operands = 0 : i64, tpu.core_type = #tpu.core_type<tc>, window_params = [{transform_indices = @transform_0, window_bounds = array<i64: 1, 64, 256>}, {pipeline_mode = #tpu.pipeline_mode<synchronous>, transform_indices = @transform_1, window_bounds = array<i64: 8, 64>}, {transform_indices = @transform_2, window_bounds = array<i64: 1, 1, 256>}]} {
    %c0 = arith.constant 0 : index
    %c0_0 = arith.constant 0 : index
    %0 = vector.load %arg3[%c0, %c0_0] : memref<8x64xf32, #tpu.memory_space<vmem>>, vector<8x64xf32>
    %c0_1 = arith.constant 0 : index
    %c0_2 = arith.constant 0 : index
    %c0_3 = arith.constant 0 : index
    %1 = vector.load %arg2[%c0_1, %c0_2, %c0_3] : memref<1x64x256xf32, #tpu.memory_space<vmem>>, vector<1x64x256xf32>
    %2 = vector.shape_cast %1 : vector<1x64x256xf32> to vector<64x256xf32>
    %cst = arith.constant dense<0.000000e+00> : vector<8x256xf32>
    %3 = tpu.matmul %0, %2, %cst {dimension_numbers = #tpu.dot_dimension_numbers<[1], [0], [0], [1], [0, 0, 1, 1], [], []>} : vector<8x64xf32>, vector<64x256xf32>, vector<8x256xf32> -> vector<8x256xf32>
    %4 = vector.extract_strided_slice %3 {offsets = [0, 0], sizes = [1, 256], strides = [1, 1]} : vector<8x256xf32> to vector<1x256xf32>
    %c0_4 = arith.constant 0 : index
    %c0_5 = arith.constant 0 : index
    %c0_6 = arith.constant 0 : index
    %5 = vector.load %arg4[%c0_4, %c0_5, %c0_6] : memref<1x1x256xf32, #tpu.memory_space<vmem>>, vector<1x1x256xf32>
    %6 = vector.shape_cast %5 : vector<1x1x256xf32> to vector<1x256xf32>
    %7 = vector.shape_cast %4 : vector<1x256xf32> to vector<1x1x256xf32>
    tpu.vector_store %arg4[%c0_4, %c0_5, %c0_6], %7 {strides = array<i32>} : memref<1x1x256xf32, #tpu.memory_space<vmem>>, vector<1x1x256xf32>,
    return
  }
  func.func @transform_0(%arg0: i32, %arg1: i32) -> (i32, i32, i32) {
    %c0_i32 = arith.constant 0 : i32
    %c0_i32_0 = arith.constant 0 : i32
    return %arg0, %c0_i32, %arg1 : i32, i32, i32
  }
  func.func @transform_1(%arg0: i32, %arg1: i32) -> (i32, i32) {
    %c0_i32 = arith.constant 0 : i32
    %c0_i32_0 = arith.constant 0 : i32
    %c0_i32_1 = arith.constant 0 : i32
    return %c0_i32, %c0_i32_0 : i32, i32
  }
  func.func @transform_2(%arg0: i32, %arg1: i32) -> (i32, i32, i32) {
    %c0_i32 = arith.constant 0 : i32
    %c0_i32_0 = arith.constant 0 : i32
    return %arg0, %c0_i32, %arg1 : i32, i32, i32
  }
}

</mosaic_0001>

<bundles_post_ra>
// kernel: net_lin_layer_forward.1
= control target key start
LH: loop header
LB: loop body
LE: loop exit
PB: predicated region body
PF: predicated region fallthrough
CT: control target
= control target key end

     0   :  { %s472_s9 = smov 0   ;;  %s474_s10 = smov 0   ;;  %s512_s0 = inlined_call_operand.vmem [shape: f32[2,64,256], index: 0, kind: input, shape index: {}]   ;;  %s513_s1 = inlined_call_operand.vmem [shape: f32[8,64], index: 1, kind: input, shape index: {}]   ;;  %s514_s2 = inlined_call_operand.vmem [shape: f32[2,1,256], index: 2, kind: output, shape index: {}]  }
   0x1   :  { %s476_s11 = smov 0  }
   0x2 LB: > { %s24_s12 = sadd.s32 1, %s449_s10  ;;  %p381_p0 = scmp.ge.s32.totalorder %s453_s11, 1  ;;  %s453_s11 = sphi %s476_s11, %s12_s11   ;;  %s449_s10 = sphi %s474_s10, %s516_s10   ;;  %s445_s9 = sphi %s472_s9, %s515_s9  }
   0x3   : > { %p26_p1 = scmp.ge.s32.totalorder %s24_s12, 2  ;;  %p133_p2 = scmp.lt.s32.totalorder %s453_s11, 3 }
   0x5   : > { %s518_s12 = smov (%p26_p1, %s24_s12), 0  ;;  %p134_p3 = pnand %p381_p0, %p133_p2 }
   0x6   : > { %p163_p4 = scmp.lt.s32.totalorder (!%p134_p3), %s445_s9, 1  ;;  %v455_v0 = vmov (!%p134_p3), 0.0   ;;  %v181_v25 = vld [vmem:[%s513_s1] sm:$0xff] (!%p134_p3)  ;;  %vm198_vm0 = vcmask (!%p134_p3), 523264   ;;  %v456_v26 = vmov (!%p134_p3), 1966171168   ;;  %v279_v28 = vlaneseq (!%p134_p3) }
   0x7   : > { %137 = sbr.rel (%p134_p3) target bundleno = 256 (0x100), region = 28  ;;  %266 = vmatprep.mubr.f32.mxu0 (!%p134_p3), %v455_v0  ;;  %v277_v27 = vunpack.c.l.s4 (!%p134_p3), %v456_v26 }
   0x8   : > { %v280_v30 = vshrl.u32 (!%p134_p3), %v279_v28, 7  ;;  %vm293_vm1 = vcmp.lt.s32.totalorder (!%p134_p3), %v279_v28, 256 }
   0x9   : > { %v278_v29 = vunpack.c.0.s8 (!%p134_p3), %v277_v27 }
   0xb   : > { %v281_v32 = vsub.s32 (!%p134_p3), %v278_v29, %v280_v30 }
   0xe   : > { %s520_s9 = smov (!%p163_p4, %s445_s9), 1 }
   0xf   : > { %s388_s13 = sshll.u32 %s520_s9, 7  ;;  %s384_s19 = sshll.u32 %s520_s9, 1 }
  0x10   : > { %s170_s16 = scalar_lea.vmem %s512_s0, %s388_s13  ;;  %s179_s22 = scalar_lea.vmem %s514_s2, %s384_s19 }
  0x11   : > { %v183_v1 = vld [vmem:[%s170_s16 + $0x8] sm:$0xff]  ;;  %v185_v2 = vld [vmem:[%s170_s16 + $0x18] sm:$0xff]  ;;  %v182_v3 = vld [vmem:[%s170_s16] sm:$0xff] }
  0x12   : > { %v389_v4 = vpack.c.bf16 %v185_v2, %v183_v1  ;;  %v184_v5 = vld [vmem:[%s170_s16 + $0x10] sm:$0xff]  ;;  %v187_v6 = vld [vmem:[%s170_s16 + $0x28] sm:$0xff]  ;;  %v189_v7 = vld [vmem:[%s170_s16 + $0x38] sm:$0xff] }
  0x13   : > { %v391_v8 = vpack.c.bf16 %v184_v5, %v182_v3  ;;  %v393_v9 = vpack.c.bf16 %v189_v7, %v187_v6  ;;  %v186_v10 = vld [vmem:[%s170_s16 + $0x20] sm:$0xff]  ;;  %v188_v11 = vld [vmem:[%s170_s16 + $0x30] sm:$0xff]  ;;  %v191_v12 = vld [vmem:[%s170_s16 + $0x48] sm:$0xff] }
  0x14   : > { %390 = vmatprep.subr.bf16.mxu0 %v389_v4  ;;  %v193_v13 = vld [vmem:[%s170_s16 + $0x58] sm:$0xff]  ;;  %v395_v14 = vpack.c.bf16 %v188_v11, %v186_v10  ;;  %v190_v16 = vld [vmem:[%s170_s16 + $0x40] sm:$0xff]  ;;  %v192_v17 = vld [vmem:[%s170_s16 + $0x50] sm:$0xff] }
  0x15   : > { %392 = vmatpush1.bf16.msra.mxu0 %v391_v8  ;;  %v397_v15 = vpack.c.bf16 %v193_v13, %v191_v12  ;;  %v195_v18 = vld [vmem:[%s170_s16 + $0x68] sm:$0xff]  ;;  %v197_v19 = vld [vmem:[%s170_s16 + $0x78] sm:$0xff]  ;;  %v399_v20 = vpack.c.bf16 %v192_v17, %v190_v16  ;;  %v194_v22 = vld [vmem:[%s170_s16 + $0x60] sm:$0xff] }
  0x16   : > { %394 = vmatprep.subr.bf16.mxu0 %v393_v9  ;;  %v401_v21 = vpack.c.bf16 %v197_v19, %v195_v18  ;;  %v196_v23 = vld [vmem:[%s170_s16 + $0x70] sm:$0xff] }
  0x17   : > { %v403_v24 = vpack.c.bf16 %v196_v23, %v194_v22 }
  0x19   : > { %396 = vmatpush1.bf16.msra.mxu0 %v395_v14 }
  0x1a   : > { %398 = vmatprep.subr.bf16.mxu0 %v397_v15 }
  0x1d   : > { %400 = vmatpush1.bf16.msra.mxu0 %v399_v20 }
  0x1e   : > { %402 = vmatprep.subr.bf16.mxu0 %v401_v21 }
  0x21   : > { %404 = vmatpush1.bf16.msra.mxu0 %v403_v24 }
  0x24   : > { %385 = vmatmul.mubr.msk.f32.vlgmr.msra.gmra.mrb[0].mxu0 %vm198_vm0, %v181_v25 }
  0xf7   : > { %v268_v31 = vpop.f32.mrb[0].mxu0 }
  0xf8   : > { %v270_v33 = vpop.f32.mrb[1].mxu0 }
  0xf9   : > { %v275_v34 = vcombine.low %v268_v31, %v270_v33 }
  0xfb   : > { %v282_v35 = vrot.slane %v275_v34, %v281_v32 }
  0xfd   : > { %v289_v36 = vrot.slane %v282_v35, %v281_v32 }
  0xff   : > { %295 = vst.msk [vmem:[%s179_s22] sm:$0x3] %vm293_vm1, %v289_v36 }
 0x100 PF: > { %s12_s11 = sadd.s32 1, %s453_s11   ;;  %s515_s9 = smov %s449_s10 }
 0x101   : > { %p9_p5 = scmp.ge.s32.totalorder %s12_s11, 4   ;;  %s516_s10 = smov %s518_s12 }
 0x103   :  { %11 = sbr.rel (!%p9_p5) target bundleno = 2 (0x2), region = 58 }

</bundles_post_ra>
